<compile_context>
chip_gen: v6e
topology: v6e:2x2x1
jax: 0.10.0
libtpu: 0.0.40
codegen_flags: <defaults>
</compile_context>

<pallas_src>
import functools
import math

import jax
import jax.numpy as jnp
from jax.experimental import pallas as pl
from jax.experimental.pallas import tpu as pltpu


# ----------------------------------------------------------------------------
# Pallas kernel
# ----------------------------------------------------------------------------

def _pos_enc_kernel(x_ref, pe_ref, o_ref, *, scale):
    # x_ref: (ts, B, D), pe_ref: (ts, 1, D)  -> broadcast over the batch (sublane) axis.
    x = x_ref[...].astype(jnp.float32)
    pe = pe_ref[...].astype(jnp.float32)
    o_ref[...] = (x * scale + pe).astype(o_ref.dtype)


def positional_encoding(x, pe, d_model, *, tile_target_bytes=2 * 1024 * 1024,
                        vmem_limit_bytes=32 * 1024 * 1024):
    """x: (S, B, D) float, pe: (max_len, 1, D).  Returns x*sqrt(d_model) + pe[:S].

    Dropout is identity (eval mode).  The grid iterates over sequence tiles so the
    working set stays well inside VMEM and DMA overlaps compute.
    """
    S, B, D = x.shape
    assert pe.shape[0] >= S and pe.shape[2] == D
    pe = pe[:S]                                         # (S, 1, D)

    itemsize = jnp.dtype(x.dtype).itemsize
    row_bytes = max(B * D * itemsize, 1)
    # ~tile_target_bytes per x tile; double-buffered in/out/pe stays far below the
    # scoped-VMEM limit on every generation (v5e/v6e/v7x).
    ts = max(1, min(S, tile_target_bytes // row_bytes))
    grid = (pl.cdiv(S, ts),)

    return pl.pallas_call(
        functools.partial(_pos_enc_kernel, scale=float(math.sqrt(d_model))),
        out_shape=jax.ShapeDtypeStruct((S, B, D), x.dtype),
        grid=grid,
        in_specs=[
            pl.BlockSpec((ts, B, D), lambda i: (i, 0, 0)),
            pl.BlockSpec((ts, 1, D), lambda i: (i, 0, 0)),
        ],
        out_specs=pl.BlockSpec((ts, B, D), lambda i: (i, 0, 0)),
        compiler_params=pltpu.CompilerParams(
            dimension_semantics=("parallel",),
            vmem_limit_bytes=vmem_limit_bytes,
        ),
    )(x, pe)


# ----------------------------------------------------------------------------
# PE buffer construction (matches the PyTorch register_buffer exactly)
# ----------------------------------------------------------------------------

def build_pe(max_len, d_model, dtype=jnp.float32):
    pos = jnp.arange(max_len, dtype=jnp.float32)[:, None]
    div = jnp.exp(jnp.arange(0, d_model, 2, dtype=jnp.float32)
                  * (-math.log(10000.0) / d_model))
    pe = jnp.zeros((max_len, d_model), dtype=jnp.float32)
    pe = pe.at[:, 0::2].set(jnp.sin(pos * div))
    pe = pe.at[:, 1::2].set(jnp.cos(pos * div))
    return pe[:, None, :].astype(dtype)                 # (max_len, 1, d_model)


# ----------------------------------------------------------------------------
# Demo / self-check
# ----------------------------------------------------------------------------

if __name__ == "__main__":
    key = jax.random.PRNGKey(0)

    # Small shapes consistent with the module: (seq, batch, d_model).
    S, B, D = 8, 2, 32
    x = jax.random.normal(key, (S, B, D), dtype=jnp.float32)
    pe = build_pe(64, D)

    out = positional_encoding(x, pe, D)
    out = jax.block_until_ready(out)

    ref = x * math.sqrt(D) + pe[:S]
    assert out.shape == (S, B, D), out.shape
    assert jnp.all(jnp.isfinite(out))
    assert jnp.allclose(out, ref, atol=1e-5, rtol=1e-5)

    # Second case: exercises a multi-step grid with a ragged last tile
    # (small per-tile byte budget forces ts=32 -> 32 grid steps, last one partial).
    S2, B2, D2 = 1000, 4, 128
    x2 = jax.random.normal(jax.random.PRNGKey(1), (S2, B2, D2), dtype=jnp.float32)
    pe2 = build_pe(2048, D2)
    out2 = positional_encoding(x2, pe2, D2, tile_target_bytes=64 * 1024)
    out2 = jax.block_until_ready(out2)

    ref2 = x2 * math.sqrt(D2) + pe2[:S2]
    assert out2.shape == (S2, B2, D2), out2.shape
    assert jnp.all(jnp.isfinite(out2))
    assert jnp.allclose(out2, ref2, atol=1e-5, rtol=1e-5)

    print("KERNEL_OK")
</pallas_src>

<mosaic_0001>
module attributes {stable_mosaic.version = 11 : i64} {
  func.func @_pos_enc_kernel(%arg0: i32, %arg1: memref<8x2x32xf32, #tpu.memory_space<vmem>>, %arg2: memref<8x1x32xf32, #tpu.memory_space<vmem>>, %arg3: memref<8x2x32xf32, #tpu.memory_space<vmem>>) attributes {dimension_semantics = [#tpu.dimension_semantics<parallel>], iteration_bounds = array<i64: 1>, scalar_prefetch = 0 : i64, scratch_operands = 0 : i64, tpu.core_type = #tpu.core_type<tc>, window_params = [{transform_indices = @transform_0, window_bounds = array<i64: 8, 2, 32>}, {transform_indices = @transform_1, window_bounds = array<i64: 8, 1, 32>}, {transform_indices = @transform_2, window_bounds = array<i64: 8, 2, 32>}]} {
    %c0 = arith.constant 0 : index
    %c0_0 = arith.constant 0 : index
    %c0_1 = arith.constant 0 : index
    %0 = vector.load %arg1[%c0, %c0_0, %c0_1] : memref<8x2x32xf32, #tpu.memory_space<vmem>>, vector<8x2x32xf32>
    %c0_2 = arith.constant 0 : index
    %c0_3 = arith.constant 0 : index
    %c0_4 = arith.constant 0 : index
    %1 = vector.load %arg2[%c0_2, %c0_3, %c0_4] : memref<8x1x32xf32, #tpu.memory_space<vmem>>, vector<8x1x32xf32>
    %cst = arith.constant 5.65685415 : f32
    %2 = vector.broadcast %cst : f32 to vector<8x2x32xf32>
    %3 = arith.mulf %0, %2 : vector<8x2x32xf32>
    %4 = vector.broadcast %1 : vector<8x1x32xf32> to vector<8x2x32xf32>
    %5 = arith.addf %3, %4 : vector<8x2x32xf32>
    %c0_5 = arith.constant 0 : index
    %c0_6 = arith.constant 0 : index
    %c0_7 = arith.constant 0 : index
    %6 = vector.load %arg3[%c0_5, %c0_6, %c0_7] : memref<8x2x32xf32, #tpu.memory_space<vmem>>, vector<8x2x32xf32>
    tpu.vector_store %arg3[%c0_5, %c0_6, %c0_7], %5 {strides = array<i32>} : memref<8x2x32xf32, #tpu.memory_space<vmem>>, vector<8x2x32xf32>,
    return
  }
  func.func @transform_0(%arg0: i32) -> (i32, i32, i32) {
    %c0_i32 = arith.constant 0 : i32
    %c0_i32_0 = arith.constant 0 : i32
    %c0_i32_1 = arith.constant 0 : i32
    return %arg0, %c0_i32, %c0_i32_0 : i32, i32, i32
  }
  func.func @transform_1(%arg0: i32) -> (i32, i32, i32) {
    %c0_i32 = arith.constant 0 : i32
    %c0_i32_0 = arith.constant 0 : i32
    %c0_i32_1 = arith.constant 0 : i32
    return %arg0, %c0_i32, %c0_i32_0 : i32, i32, i32
  }
  func.func @transform_2(%arg0: i32) -> (i32, i32, i32) {
    %c0_i32 = arith.constant 0 : i32
    %c0_i32_0 = arith.constant 0 : i32
    %c0_i32_1 = arith.constant 0 : i32
    return %arg0, %c0_i32, %c0_i32_0 : i32, i32, i32
  }
}

</mosaic_0001>

<bundles_post_ra>
// kernel: tpu_custom_call.1
= control target key start
LH: loop header
LB: loop body
LE: loop exit
PB: predicated region body
PF: predicated region fallthrough
CT: control target
= control target key end

     0   :  { %7 = vsyncpa [#allocation3], 0  ;;  %s276_s0 = inlined_call_operand.hbm [shape: f32[8,2,32], index: 0, kind: input, shape index: {}]   ;;  %s277_s1 = inlined_call_operand.hbm [shape: f32[8,1,32], index: 1, kind: input, shape index: {}]   ;;  %s278_s2 = inlined_call_operand.hbm [shape: f32[8,2,32], index: 2, kind: output, shape index: {}]  }
   0x1   :  { %8 = vsyncpa [#allocation6], 0 }
   0x2   :  { %9 = vsyncpa [#allocation4], 0  ;;  %s228_s9 = smov [#allocation2]  }
   0x3   :  { %s15_s10 = sshll.u32 %s228_s9, 4  ;;  %s16_s10 = int_to_ptr.vmem [resolvable:$true] %s15_s10 }
   0x4   :  { %s170_s11 = scalar_lea.vmem %s16_s10, 256  ;;  %p175_p1 = scmp.lt.s32.totalorder %s16_s10, %s16_s10 }
   0x5   :  { %p171_p0 = scmp.ne.s32.totalorder %s16_s10, %s170_s11  ;;  %p176_p2 = scmp.lt.s32.totalorder %s170_s11, %s170_s11 }
   0x7   :  { %p177_p3 = por %p176_p2, %p175_p1 }
   0x9   :  { %p178_p4 = pnand %p177_p3, %p171_p0 }
   0xb   :  { %181 = shalt.err (!%p178_p4)
}
   0xc   :  { %s229_s12 = smov 32   ;;  %s230_s13 = smov 2  }
   0xd   :  { %21 = dma.hbm_to_vmem [thread:$0]  %s276_s0, 256, %s16_s10, [#allocation3], %s229_s12, %s229_s12, %s230_s13  }
   0xe   :  { %s231_s16 = smov [#allocation5]  }
   0xf   :  { %s27_s17 = sshll.u32 %s231_s16, 4  ;;  %s28_s17 = int_to_ptr.vmem [resolvable:$true] %s27_s17 }
  0x10   :  { %s190_s18 = scalar_lea.vmem %s28_s17, 128  ;;  %p195_p6 = scmp.lt.s32.totalorder %s28_s17, %s28_s17 }
  0x11   :  { %p191_p5 = scmp.ne.s32.totalorder %s28_s17, %s190_s18  ;;  %p196_p7 = scmp.lt.s32.totalorder %s190_s18, %s190_s18 }
  0x13   :  { %p197_p8 = por %p196_p7, %p195_p6 }
  0x15   :  { %p198_p9 = pnand %p197_p8, %p191_p5 }
  0x17   :  { %201 = shalt.err (!%p198_p9)
}
  0x18   :  { %s232_s19 = smov 16   ;;  %s233_s20 = smov 1  }
  0x19   :  { %33 = dma.hbm_to_vmem [thread:$0]  %s277_s1, 128, %s28_s17, [#allocation6], %s232_s19, %s232_s19, %s233_s20  }
  0x1a   :  { %222 = dma.done.wait [#allocation3], 256  }
  0x1b   :  { %223 = vsyncadd [#allocation3], 4294967040 }
  0x1c   :  { %224 = dma.done.wait [#allocation6], 128  }
  0x1d   :  { %225 = vsyncadd [#allocation6], 4294967168  ;;  %vm120_vm0 = vcmask 254976   ;;  %s234_s0 = smov [#allocation7]   ;;  %v40_v0 = vld [vmem:[#allocation2] sm:$0x3] }
  0x1e   :  { %s259_s23 = sshll.u32 %s234_s0, 4  ;;  %v147_v1 = vld [vmem:[#allocation5] ss:$0 sm:$0xff]  ;;  %v41_v2 = vld [vmem:[#allocation2 + $0x2] sm:$0x3]  ;;  %s135_s23 = int_to_ptr.vmem [resolvable:$true] %s259_s23 }
  0x1f   :  { %v56_v3 = vmul.f32 5.656854, %v40_v0  ;;  %v148_v4 = vld [vmem:[#allocation5 + $0x1] ss:$0 sm:$0xff]  ;;  %v57_v5 = vmul.f32 5.656854, %v41_v2  ;;  %p207_p11 = scmp.lt.s32.totalorder %s135_s23, %s135_s23 }
  0x20   :  { %v42_v6 = vld [vmem:[#allocation2 + $0x4] sm:$0x3]  ;;  %v149_v7 = vld [vmem:[#allocation5 + $0x2] ss:$0 sm:$0xff]  ;;  %v43_v8 = vld [vmem:[#allocation2 + $0x6] sm:$0x3] }
  0x21   :  { %v112_v9 = vadd.f32 %v147_v1, %v56_v3  ;;  %v113_v10 = vadd.f32 %v148_v4, %v57_v5  ;;  %v58_v11 = vmul.f32 5.656854, %v42_v6  ;;  %v150_v12 = vld [vmem:[#allocation5 + $0x3] ss:$0 sm:$0xff]  ;;  %v59_v13 = vmul.f32 5.656854, %v43_v8 }
  0x22   :  { %v44_v14 = vld [vmem:[#allocation2 + $0x8] sm:$0x3]  ;;  %v151_v15 = vld [vmem:[#allocation5 + $0x4] ss:$0 sm:$0xff]  ;;  %v45_v16 = vld [vmem:[#allocation2 + $0xa] sm:$0x3] }
  0x23   :  { %121 = vst.msk [vmem:[#allocation7] sm:$0x3] %vm120_vm0, %v112_v9  ;;  %122 = vst.msk [vmem:[#allocation7 + $0x2] sm:$0x3] %vm120_vm0, %v113_v10  ;;  %v114_v17 = vadd.f32 %v149_v7, %v58_v11  ;;  %v115_v18 = vadd.f32 %v150_v12, %v59_v13  ;;  %v60_v19 = vmul.f32 5.656854, %v44_v14 }
  0x24   :  { %v152_v20 = vld [vmem:[#allocation5 + $0x5] ss:$0 sm:$0xff]  ;;  %v61_v21 = vmul.f32 5.656854, %v45_v16  ;;  %v46_v22 = vld [vmem:[#allocation2 + $0xc] sm:$0x3] }
  0x25   :  { %v153_v23 = vld [vmem:[#allocation5 + $0x6] ss:$0 sm:$0xff]  ;;  %v47_v24 = vld [vmem:[#allocation2 + $0xe] sm:$0x3]  ;;  %123 = vst.msk [vmem:[#allocation7 + $0x4] sm:$0x3] %vm120_vm0, %v114_v17  ;;  %v116_v25 = vadd.f32 %v151_v15, %v60_v19 }
  0x26   :  { %124 = vst.msk [vmem:[#allocation7 + $0x6] sm:$0x3] %vm120_vm0, %v115_v18  ;;  %v117_v26 = vadd.f32 %v152_v20, %v61_v21  ;;  %v62_v27 = vmul.f32 5.656854, %v46_v22  ;;  %v154_v28 = vld [vmem:[#allocation5 + $0x7] ss:$0 sm:$0xff] }
  0x27   :  { %v63_v29 = vmul.f32 5.656854, %v47_v24  ;;  %125 = vst.msk [vmem:[#allocation7 + $0x8] sm:$0x3] %vm120_vm0, %v116_v25  ;;  %s202_s1 = scalar_lea.vmem %s135_s23, 256 }
  0x28   :  { %126 = vst.msk [vmem:[#allocation7 + $0xa] sm:$0x3] %vm120_vm0, %v117_v26  ;;  %v118_v30 = vadd.f32 %v153_v23, %v62_v27  ;;  %p203_p10 = scmp.ne.s32.totalorder %s135_s23, %s202_s1  ;;  %p208_p12 = scmp.lt.s32.totalorder %s202_s1, %s202_s1 }
  0x29   :  { %v119_v31 = vadd.f32 %v154_v28, %v63_v29 }
  0x2a   :  { %127 = vst.msk [vmem:[#allocation7 + $0xc] sm:$0x3] %vm120_vm0, %v118_v30  ;;  %p209_p13 = por %p208_p12, %p207_p11 }
  0x2b   :  { %128 = vst.msk [vmem:[#allocation7 + $0xe] sm:$0x3] %vm120_vm0, %v119_v31 }
  0x2c   :  { %p210_p0 = pnand %p209_p13, %p203_p10 }
  0x2e   :  { %213 = shalt.err (!%p210_p0)
}
  0x2f   :  { %140 = dma.vmem_to_hbm [thread:$0]  %s135_s23, 256, %s278_s2, [#allocation4], %s229_s12, %s229_s12, %s230_s13  }
  0x30   :  { %226 = dma.done.wait [#allocation4], 256  }
  0x31   :  { %227 = vsyncadd [#allocation4], 4294967040 }
  0x32   :  { %144 = vsyncpa [#allocation3], 1 }
  0x33   :  { %145 = vsyncpa [#allocation6], 1 }
  0x34   :  { %146 = vsyncpa [#allocation4], 1 }

</bundles_post_ra>
